<compile_context>
chip_gen: v7x
topology: tpu7x:2x2x1
jax: 0.10.0
libtpu: 0.0.40
codegen_flags: <defaults>
</compile_context>

<pallas_src>
import functools
import math

import jax
import jax.numpy as jnp
from jax import lax
from jax.experimental import pallas as pl
from jax.experimental.pallas import tpu as pltpu


def _round_up(n, m):
    return ((n + m - 1) // m) * m


def _mish(x):
    # mish(x) = x * tanh(softplus(x))
    return x * jnp.tanh(jax.nn.softplus(x))


def _mish_and_grad(x):
    t = jnp.tanh(jax.nn.softplus(x))
    s = jax.nn.sigmoid(x)
    return x * t, t + x * (1.0 - t * t) * s


# --------------------------------------------------------------------------
# Parameters
# --------------------------------------------------------------------------
def make_value_params(key, d_in, hidden, time_dim):
    """Deterministic synthetic parameters (no checkpoint loading)."""
    k1, k2, k3 = jax.random.split(key, 3)
    scale1 = 1.0 / jnp.sqrt(jnp.float32(d_in))
    scale2 = 1.0 / jnp.sqrt(jnp.float32(hidden))
    return dict(
        time_dim=time_dim,
        hidden=hidden,
        w1=jax.random.normal(k1, (d_in, hidden), jnp.float32) * scale1,
        b1=jnp.zeros((1, hidden), jnp.float32),
        w2=jax.random.normal(k2, (hidden, hidden), jnp.float32) * scale2,
        b2=jnp.zeros((1, hidden), jnp.float32),
        w3=jax.random.normal(k3, (hidden, 1), jnp.float32) * scale2,
        b3=jnp.zeros((1, 1), jnp.float32),
    )


def _pack_params(params, d_x):
    """Pack W1(x|sin|cos) / b1 / W2 / b2 / w3 / b3 into one zero-padded
    (K, hidden) f32 buffer (one DMA stream).  Each section starts on an
    8-sublane boundary so in-kernel static slices stay tile-aligned."""
    H = params["hidden"]
    half = params["time_dim"] // 2
    w1 = params["w1"]
    sections = [
        ("w1x", w1[:d_x], d_x),
        ("w1s", w1[d_x:d_x + half], half),
        ("w1c", w1[d_x + half:d_x + 2 * half], half),
        ("b1", params["b1"], 1),
        ("w2", params["w2"], H),
        ("b2", params["b2"], 1),
        ("w3", params["w3"].T, 1),                      # (1, H) row
        ("b3", jnp.broadcast_to(params["b3"], (1, H)), 1),
    ]
    offs, bufs, cur = {}, [], 0
    for name, arr, nrows in sections:
        offs[name] = cur
        padded = _round_up(nrows, 8)
        buf = jnp.zeros((padded, H), jnp.float32).at[:nrows].set(
            arr.astype(jnp.float32))
        bufs.append(buf)
        cur += padded
    return jnp.concatenate(bufs, axis=0), offs


# --------------------------------------------------------------------------
# Kernels
# --------------------------------------------------------------------------
def _kernel_body(x, t_col, p_ref, d_x, half, H, offs, want_grad):
    """Shared fused body: time-embedding + 2-layer mish MLP + scalar head.
    If want_grad, also returns d(value)/d(x_flat)."""
    # Sinusoidal time embedding, computed in-kernel (EUP slot is idle here).
    j = lax.broadcasted_iota(jnp.int32, (1, half), 1).astype(jnp.float32)
    freqs = jnp.exp(-jnp.log(10000.0) * j / jnp.float32(half - 1))
    ang = t_col * freqs                                   # (Bp, half)
    sin_e = jnp.sin(ang)
    cos_e = jnp.cos(ang)

    # Static slices of the single packed parameter operand.
    w1x = p_ref[offs["w1x"]:offs["w1x"] + d_x, :]
    w1s = p_ref[offs["w1s"]:offs["w1s"] + half, :]
    w1c = p_ref[offs["w1c"]:offs["w1c"] + half, :]
    b1 = p_ref[offs["b1"]:offs["b1"] + 1, :]
    w2 = p_ref[offs["w2"]:offs["w2"] + H, :]
    b2 = p_ref[offs["b2"]:offs["b2"] + 1, :]
    w3r = p_ref[offs["w3"]:offs["w3"] + 1, :]             # (1, H)
    b3 = p_ref[offs["b3"]:offs["b3"] + 1, 0:1]            # (1, 1)

    # Layer 1: split matmul (x | sin | cos) avoids a lane-dim concat.
    z1 = (jnp.dot(x, w1x, preferred_element_type=jnp.float32)
          + jnp.dot(sin_e, w1s, preferred_element_type=jnp.float32)
          + jnp.dot(cos_e, w1c, preferred_element_type=jnp.float32)
          + b1)
    if want_grad:
        h1, dh1 = _mish_and_grad(z1)
    else:
        h1 = _mish(z1)

    # Layer 2.
    z2 = jnp.dot(h1, w2, preferred_element_type=jnp.float32) + b2
    if want_grad:
        h2, dh2 = _mish_and_grad(z2)
    else:
        h2 = _mish(z2)

    # Head (hidden -> 1): VPU multiply + XLU lane reduction, no N=1 MXU pass.
    y = jnp.sum(h2 * w3r, axis=-1, keepdims=True) + b3    # (Bp, 1)

    if not want_grad:
        return y, None

    # Backward w.r.t. x only (what ValueGuide.gradients needs).
    g_z2 = w3r * dh2                                      # (Bp, H)
    g_h1 = lax.dot_general(g_z2, w2, (((1,), (1,)), ((), ())),
                           preferred_element_type=jnp.float32)   # g_z2 @ W2^T
    g_z1 = g_h1 * dh1                                     # (Bp, H)
    g_x = lax.dot_general(g_z1, w1x, (((1,), (1,)), ((), ())),
                          preferred_element_type=jnp.float32)    # g_z1 @ W1x^T
    return y, g_x


def _fwd_kernel(x_ref, t_ref, p_ref, y_ref, *, d_x, half, H, offs):
    y, _ = _kernel_body(x_ref[...], t_ref[...], p_ref, d_x, half, H, offs,
                        want_grad=False)
    y_ref[...] = y.astype(y_ref.dtype)


def _fwd_bwd_kernel(x_ref, t_ref, p_ref, y_ref, gx_ref, *, d_x, half, H, offs):
    y, g_x = _kernel_body(x_ref[...], t_ref[...], p_ref, d_x, half, H, offs,
                          want_grad=True)
    y_ref[...] = y.astype(y_ref.dtype)
    gx_ref[...] = g_x.astype(gx_ref.dtype)


# --------------------------------------------------------------------------
# Wrappers (glue: padding, reshapes, squeeze — metadata-only work)
# --------------------------------------------------------------------------
def _prep(x, t):
    B = x.shape[0]
    d_x = math.prod(x.shape[1:])
    Bp = _round_up(max(B, 8), 8)                 # sublane-regular batch
    x_flat = x.reshape(B, d_x).astype(jnp.float32)
    x_p = jnp.zeros((Bp, d_x), jnp.float32).at[:B].set(x_flat)
    t_p = jnp.zeros((Bp, 1), jnp.float32).at[:B, 0].set(t.astype(jnp.float32))
    return x_p, t_p, B, Bp, d_x


def value_guide_forward(x, cond, t, params):
    """ValueGuide.forward: model(x, cond, t).squeeze(-1) -> (B,)."""
    del cond  # unused by the value net, matching diffuser's ValueFunction
    x_p, t_p, B, Bp, d_x = _prep(x, t)
    H = params["hidden"]
    half = params["time_dim"] // 2
    packed, offs = _pack_params(params, d_x)

    full = lambda shape: pl.BlockSpec(shape, lambda i: (0,) * len(shape))
    kernel = functools.partial(_fwd_kernel, d_x=d_x, half=half, H=H, offs=offs)
    out = pl.pallas_call(
        kernel,
        out_shape=jax.ShapeDtypeStruct((Bp, 1), jnp.float32),
        grid=(1,),  # tiny problem: single step, full-array blocks in VMEM
        in_specs=[full((Bp, d_x)), full((Bp, 1)), full(packed.shape)],
        out_specs=full((Bp, 1)),
        compiler_params=pltpu.CompilerParams(
            dimension_semantics=("arbitrary",)),
    )(x_p, t_p, packed)
    # squeeze(-1) + batch un-pad in the wrapper (free metadata ops).
    return out[:B, 0]


def value_guide_gradients(x, cond, t, params):
    """ValueGuide.gradients: (y, d(sum y)/dx) from one fused fwd+bwd kernel."""
    del cond
    x_p, t_p, B, Bp, d_x = _prep(x, t)
    H = params["hidden"]
    half = params["time_dim"] // 2
    packed, offs = _pack_params(params, d_x)

    full = lambda shape: pl.BlockSpec(shape, lambda i: (0,) * len(shape))
    kernel = functools.partial(_fwd_bwd_kernel, d_x=d_x, half=half, H=H,
                               offs=offs)
    y_p, g_p = pl.pallas_call(
        kernel,
        out_shape=(jax.ShapeDtypeStruct((Bp, 1), jnp.float32),
                   jax.ShapeDtypeStruct((Bp, d_x), jnp.float32)),
        grid=(1,),
        in_specs=[full((Bp, d_x)), full((Bp, 1)), full(packed.shape)],
        out_specs=[full((Bp, 1)), full((Bp, d_x))],
        compiler_params=pltpu.CompilerParams(
            dimension_semantics=("arbitrary",)),
    )(x_p, t_p, packed)
    return y_p[:B, 0], g_p[:B].reshape(x.shape)


# --------------------------------------------------------------------------
# Pure-JAX reference (for correctness checking)
# --------------------------------------------------------------------------
def sinusoidal_time_embedding(t, dim):
    half = dim // 2
    freqs = jnp.exp(-jnp.log(10000.0) * jnp.arange(half, dtype=jnp.float32)
                    / jnp.float32(half - 1))
    ang = t.astype(jnp.float32)[:, None] * freqs[None, :]
    return jnp.concatenate([jnp.sin(ang), jnp.cos(ang)], axis=-1)


def value_guide_forward_ref(x, cond, t, params):
    del cond
    B = x.shape[0]
    feat = jnp.concatenate(
        [x.reshape(B, -1).astype(jnp.float32),
         sinusoidal_time_embedding(t, params["time_dim"])], axis=-1)
    h1 = _mish(feat @ params["w1"] + params["b1"])
    h2 = _mish(h1 @ params["w2"] + params["b2"])
    val = h2 @ params["w3"] + params["b3"]
    return jnp.squeeze(val, axis=-1)


if __name__ == "__main__":
    key = jax.random.PRNGKey(0)
    k_x, k_cond, k_t, k_params = jax.random.split(key, 4)

    # Small shapes implied by the diffuser value-guide setting:
    #   x    : (batch, horizon, transition_dim) trajectory
    #   cond : first-state conditioning (unused by the value net)
    #   t    : integer diffusion timestep per batch element
    B, horizon, transition_dim = 2, 8, 4
    time_dim, hidden = 16, 32

    x = jax.random.normal(k_x, (B, horizon, transition_dim), jnp.float32)
    cond = jax.random.normal(k_cond, (B, transition_dim), jnp.float32)
    t = jax.random.randint(k_t, (B,), 0, 100, jnp.int32)

    d_in = horizon * transition_dim + time_dim
    params = make_value_params(k_params, d_in, hidden, time_dim)

    # Forward (ValueGuide.forward).
    y = jax.block_until_ready(value_guide_forward(x, cond, t, params))
    y_ref = value_guide_forward_ref(x, cond, t, params)
    assert y.shape == (B,), y.shape
    assert jnp.allclose(y, y_ref, atol=1e-5, rtol=1e-5), (y, y_ref)

    # Gradients (ValueGuide.gradients) via the fused fwd+bwd kernel.
    y2, g = jax.block_until_ready(value_guide_gradients(x, cond, t, params))
    g_ref = jax.grad(
        lambda xx: value_guide_forward_ref(xx, cond, t, params).sum())(x)
    assert g.shape == x.shape, g.shape
    assert jnp.allclose(y2, y_ref, atol=1e-5, rtol=1e-5), (y2, y_ref)
    assert jnp.allclose(g, g_ref, atol=1e-4, rtol=1e-4), (g, g_ref)

    # TODO(synk): for production batch sizes (B >> 8) tile the batch axis
    # with a "parallel" grid dimension so v7x's second TensorCore is used.
    print("KERNEL_OK")
</pallas_src>

<mosaic_0001>
module attributes {stable_mosaic.version = 11 : i64} {
  func.func @_fwd_kernel(%arg0: i32, %arg1: memref<8x32xf32, #tpu.memory_space<vmem>>, %arg2: memref<8x1xf32, #tpu.memory_space<vmem>>, %arg3: memref<112x32xf32, #tpu.memory_space<vmem>>, %arg4: memref<8x1xf32, #tpu.memory_space<vmem>>) attributes {dimension_semantics = [#tpu.dimension_semantics<arbitrary>], iteration_bounds = array<i64: 1>, scalar_prefetch = 0 : i64, scratch_operands = 0 : i64, tpu.core_type = #tpu.core_type<tc>, window_params = [{pipeline_mode = #tpu.pipeline_mode<synchronous>, transform_indices = @transform_0, window_bounds = array<i64: 8, 32>}, {pipeline_mode = #tpu.pipeline_mode<synchronous>, transform_indices = @transform_1, window_bounds = array<i64: 8, 1>}, {pipeline_mode = #tpu.pipeline_mode<synchronous>, transform_indices = @transform_2, window_bounds = array<i64: 112, 32>}, {pipeline_mode = #tpu.pipeline_mode<synchronous>, transform_indices = @transform_3, window_bounds = array<i64: 8, 1>}]} {
    %c0 = arith.constant 0 : index
    %c0_0 = arith.constant 0 : index
    %0 = vector.load %arg1[%c0, %c0_0] : memref<8x32xf32, #tpu.memory_space<vmem>>, vector<8x32xf32>
    %c0_1 = arith.constant 0 : index
    %c0_2 = arith.constant 0 : index
    %1 = vector.load %arg2[%c0_1, %c0_2] : memref<8x1xf32, #tpu.memory_space<vmem>>, vector<8x1xf32>
    %2 = tpu.iota {dimensions = array<i32: 1>} : vector<1x8xi32>
    %3 = arith.sitofp %2 : vector<1x8xi32> to vector<1x8xf32>
    %cst = arith.constant 1.000000e+04 : f32
    %4 = math.log %cst : f32
    %cst_3 = arith.constant 0.000000e+00 : f32
    %5 = arith.subf %cst_3, %4 : f32
    %6 = vector.broadcast %5 : f32 to vector<1x8xf32>
    %7 = arith.mulf %6, %3 : vector<1x8xf32>
    %cst_4 = arith.constant 7.000000e+00 : f32
    %8 = vector.broadcast %cst_4 : f32 to vector<1x8xf32>
    %9 = arith.divf %7, %8 : vector<1x8xf32>
    %10 = math.exp %9 : vector<1x8xf32>
    %11 = vector.broadcast %1 : vector<8x1xf32> to vector<8x8xf32>
    %12 = vector.broadcast %10 : vector<1x8xf32> to vector<8x8xf32>
    %13 = arith.mulf %11, %12 : vector<8x8xf32>
    %14 = math.sin %13 : vector<8x8xf32>
    %15 = math.cos %13 : vector<8x8xf32>
    %c0_5 = arith.constant 0 : index
    %c0_6 = arith.constant 0 : index
    %16 = vector.load %arg3[%c0_5, %c0_6] : memref<112x32xf32, #tpu.memory_space<vmem>>, vector<32x32xf32>
    %c32 = arith.constant 32 : index
    %c0_7 = arith.constant 0 : index
    %17 = vector.load %arg3[%c32, %c0_7] : memref<112x32xf32, #tpu.memory_space<vmem>>, vector<8x32xf32>
    %c40 = arith.constant 40 : index
    %c0_8 = arith.constant 0 : index
    %18 = vector.load %arg3[%c40, %c0_8] : memref<112x32xf32, #tpu.memory_space<vmem>>, vector<8x32xf32>
    %c48 = arith.constant 48 : index
    %c0_9 = arith.constant 0 : index
    %19 = vector.load %arg3[%c48, %c0_9] : memref<112x32xf32, #tpu.memory_space<vmem>>, vector<1x32xf32>
    %c56 = arith.constant 56 : index
    %c0_10 = arith.constant 0 : index
    %20 = vector.load %arg3[%c56, %c0_10] : memref<112x32xf32, #tpu.memory_space<vmem>>, vector<32x32xf32>
    %c88 = arith.constant 88 : index
    %c0_11 = arith.constant 0 : index
    %21 = vector.load %arg3[%c88, %c0_11] : memref<112x32xf32, #tpu.memory_space<vmem>>, vector<1x32xf32>
    %c96 = arith.constant 96 : index
    %c0_12 = arith.constant 0 : index
    %22 = vector.load %arg3[%c96, %c0_12] : memref<112x32xf32, #tpu.memory_space<vmem>>, vector<1x32xf32>
    %c104 = arith.constant 104 : index
    %c0_13 = arith.constant 0 : index
    %23 = vector.load %arg3[%c104, %c0_13] : memref<112x32xf32, #tpu.memory_space<vmem>>, vector<1x1xf32>
    %cst_14 = arith.constant dense<0.000000e+00> : vector<8x32xf32>
    %24 = tpu.matmul %0, %16, %cst_14 {dimension_numbers = #tpu.dot_dimension_numbers<[1], [0], [0], [1], [0, 0, 1, 1], [], []>} : vector<8x32xf32>, vector<32x32xf32>, vector<8x32xf32> -> vector<8x32xf32>
    %cst_15 = arith.constant dense<0.000000e+00> : vector<8x32xf32>
    %25 = tpu.matmul %14, %17, %cst_15 {dimension_numbers = #tpu.dot_dimension_numbers<[1], [0], [0], [1], [0, 0, 1, 1], [], []>} : vector<8x8xf32>, vector<8x32xf32>, vector<8x32xf32> -> vector<8x32xf32>
    %26 = arith.addf %24, %25 : vector<8x32xf32>
    %cst_16 = arith.constant dense<0.000000e+00> : vector<8x32xf32>
    %27 = tpu.matmul %15, %18, %cst_16 {dimension_numbers = #tpu.dot_dimension_numbers<[1], [0], [0], [1], [0, 0, 1, 1], [], []>} : vector<8x8xf32>, vector<8x32xf32>, vector<8x32xf32> -> vector<8x32xf32>
    %28 = arith.addf %26, %27 : vector<8x32xf32>
    %29 = vector.broadcast %19 : vector<1x32xf32> to vector<8x32xf32>
    %30 = arith.addf %28, %29 : vector<8x32xf32>
    %cst_17 = arith.constant 0.000000e+00 : f32
    %31 = vector.broadcast %cst_17 : f32 to vector<8x32xf32>
    %32 = arith.maximumf %30, %31 : vector<8x32xf32>
    %33 = vector.broadcast %cst_17 : f32 to vector<8x32xf32>
    %34 = arith.subf %30, %33 : vector<8x32xf32>
    %35 = arith.cmpf one, %34, %34 : vector<8x32xf32>
    %36 = vector.broadcast %cst_17 : f32 to vector<8x32xf32>
    %37 = arith.addf %30, %36 : vector<8x32xf32>
    %38 = math.absf %34 : vector<8x32xf32>
    %cst_18 = arith.constant 0.000000e+00 : f32
    %39 = vector.broadcast %cst_18 : f32 to vector<8x32xf32>
    %40 = arith.subf %39, %38 : vector<8x32xf32>
    %41 = math.exp %40 : vector<8x32xf32>
    %42 = math.log1p %41 : vector<8x32xf32>
    %43 = arith.addf %32, %42 : vector<8x32xf32>
    %44 = arith.select %35, %37, %43 : vector<8x32xi1>, vector<8x32xf32>
    %45 = math.tanh %44 : vector<8x32xf32>
    %46 = arith.mulf %30, %45 : vector<8x32xf32>
    %cst_19 = arith.constant dense<0.000000e+00> : vector<8x32xf32>
    %47 = tpu.matmul %46, %20, %cst_19 {dimension_numbers = #tpu.dot_dimension_numbers<[1], [0], [0], [1], [0, 0, 1, 1], [], []>} : vector<8x32xf32>, vector<32x32xf32>, vector<8x32xf32> -> vector<8x32xf32>
    %48 = vector.broadcast %21 : vector<1x32xf32> to vector<8x32xf32>
    %49 = arith.addf %47, %48 : vector<8x32xf32>
    %cst_20 = arith.constant 0.000000e+00 : f32
    %50 = vector.broadcast %cst_20 : f32 to vector<8x32xf32>
    %51 = arith.maximumf %49, %50 : vector<8x32xf32>
    %52 = vector.broadcast %cst_20 : f32 to vector<8x32xf32>
    %53 = arith.subf %49, %52 : vector<8x32xf32>
    %54 = arith.cmpf one, %53, %53 : vector<8x32xf32>
    %55 = vector.broadcast %cst_20 : f32 to vector<8x32xf32>
    %56 = arith.addf %49, %55 : vector<8x32xf32>
    %57 = math.absf %53 : vector<8x32xf32>
    %cst_21 = arith.constant 0.000000e+00 : f32
    %58 = vector.broadcast %cst_21 : f32 to vector<8x32xf32>
    %59 = arith.subf %58, %57 : vector<8x32xf32>
    %60 = math.exp %59 : vector<8x32xf32>
    %61 = math.log1p %60 : vector<8x32xf32>
    %62 = arith.addf %51, %61 : vector<8x32xf32>
    %63 = arith.select %54, %56, %62 : vector<8x32xi1>, vector<8x32xf32>
    %64 = math.tanh %63 : vector<8x32xf32>
    %65 = arith.mulf %49, %64 : vector<8x32xf32>
    %66 = vector.broadcast %22 : vector<1x32xf32> to vector<8x32xf32>
    %67 = arith.mulf %65, %66 : vector<8x32xf32>
    %cst_22 = arith.constant dense<0.000000e+00> : vector<8xf32>
    %68 = vector.multi_reduction <add>, %67, %cst_22 [1] : vector<8x32xf32> to vector<8xf32>
    %69 = vector.shape_cast %68 : vector<8xf32> to vector<8x1xf32>
    %70 = vector.broadcast %23 : vector<1x1xf32> to vector<8x1xf32>
    %71 = arith.addf %69, %70 : vector<8x1xf32>
    %c0_23 = arith.constant 0 : index
    %c0_24 = arith.constant 0 : index
    %72 = vector.load %arg4[%c0_23, %c0_24] : memref<8x1xf32, #tpu.memory_space<vmem>>, vector<8x1xf32>
    tpu.vector_store %arg4[%c0_23, %c0_24], %71 {strides = array<i32>} : memref<8x1xf32, #tpu.memory_space<vmem>>, vector<8x1xf32>,
    return
  }
  func.func @transform_0(%arg0: i32) -> (i32, i32) {
    %c0_i32 = arith.constant 0 : i32
    %c0_i32_0 = arith.constant 0 : i32
    %c0_i32_1 = arith.constant 0 : i32
    return %c0_i32, %c0_i32_0 : i32, i32
  }
  func.func @transform_1(%arg0: i32) -> (i32, i32) {
    %c0_i32 = arith.constant 0 : i32
    %c0_i32_0 = arith.constant 0 : i32
    %c0_i32_1 = arith.constant 0 : i32
    return %c0_i32, %c0_i32_0 : i32, i32
  }
  func.func @transform_2(%arg0: i32) -> (i32, i32) {
    %c0_i32 = arith.constant 0 : i32
    %c0_i32_0 = arith.constant 0 : i32
    %c0_i32_1 = arith.constant 0 : i32
    return %c0_i32, %c0_i32_0 : i32, i32
  }
  func.func @transform_3(%arg0: i32) -> (i32, i32) {
    %c0_i32 = arith.constant 0 : i32
    %c0_i32_0 = arith.constant 0 : i32
    %c0_i32_1 = arith.constant 0 : i32
    return %c0_i32, %c0_i32_0 : i32, i32
  }
}

</mosaic_0001>

<bundles_post_ra>
// kernel: tpu_custom_call.1
= control target key start
LH: loop header
LB: loop body
LE: loop exit
PB: predicated region body
PF: predicated region fallthrough
CT: control target
= control target key end

     0   :  { %v721_v0 = vmov 0   ;;  %v722_v2 = vmov 0.0   ;;  %vm723_vm0 = vmmov 0   ;;  %v724_v5 = vmov 0.0|0.0   ;;  %s842_s1 = inlined_call_operand.vmem [shape: f32[8,1], index: 1, kind: input, shape index: {}]   ;;  %s843_s2 = inlined_call_operand.vmem [shape: f32[112,32], index: 2, kind: input, shape index: {}]   ;;  %s844_s0 = inlined_call_operand.vmem [shape: f32[8,32], index: 0, kind: input, shape index: {}]   ;;  %s845_s3 = inlined_call_operand.vmem [shape: f32[8,1], index: 3, kind: output, shape index: {}]  }
   0x1   :  { %702 = vset.pattern.permute.xlu0 %v721_v0  ;;  %v15_v1 = vld [vmem:[%s842_s1] sm:$0xff]  ;;  %644 = vmatprep.subr.mxu1 %v722_v2  ;;  %v242_v4 = vld [vmem:[%s843_s2 + $0x28] sm:$0xff]  ;;  %v16_v6 = vlaneseq  ;;  %v725_v25 = vmov 683565275   ;;  %v726_v27 = vmov 2475754826  }
   0x2   :  { %26 = vperm.xlu0 %702, %v15_v1   ;;  %v241_v3 = vld [vmem:[%s843_s2 + $0x20] sm:$0xff]  ;;  %660 = vmatprep.subr.mxu0 %v722_v2  ;;  %v727_v30 = vmov 2131351028   ;;  %v728_v33 = vmov 2102212464   ;;  %vm251_vm10 = vcmask 64512  }
   0x3   :  { %645 = vmatpush3.msra.mxu1 %v241_v3  ;;  %646 = vmatprep.mubr.msk.f32.mxu1 %vm723_vm0, %v722_v2  ;;  %v17_v7 = vand.u32 127, %v16_v6  ;;  %v729_v36 = vmov 920167782   ;;  %v730_v39 = vmov 1326507024  }
   0x4   :  { %676 = vmatprep.subr.bf16.mxu1 %v724_v5  ;;  %661 = vmatpush3.msra.mxu0 %v242_v4 }
   0x5   :  { %662 = vmatprep.mubr.msk.f32.mxu0 %vm723_vm0, %v722_v2  ;;  %682 = vmatprep.subr.bf16.mxu0 %v724_v5  ;;  %v18_v8 = vcvt.s32.f32 %v17_v7 }
   0x7   :  { %v19_v9 = vmul.f32 -9.2103405, %v18_v8 }
   0x9   :  { %v21_v10 = vmul.f32 0.14285715, %v19_v9 }
   0xb   :  { %v22_v11 = vmul.f32 1.442695, %v21_v10 }
   0xd   :  { %703 = vpow2.f32 %v22_v11 }
  0x17   :  { %v704_v12 = vpop.eup %703 }
  0x81   :  { %v27_v13 = vpop.permute.xlu0 %26 }
  0x82   :  { %v768_v14 = vmul.f32 %v704_v12, %v27_v13 }
  0x84   :  { %v33_v15 = vand.u32 2139095040, %v768_v14  ;;  %v30_v19 = vand.u32 2147483647, %v768_v14  ;;  %vm32_vm8 = vcmp.lt.s32.totalorder %v768_v14, 0 }
  0x86   :  { %v34_v16 = vshrl.u32 %v33_v15, 23  ;;  %v37_v22 = vand.u32 8388607, %v30_v19  ;;  %vm31_vm9 = vcmp.le.f32.partialorder %v30_v19, 0.7853982 }
  0x88   :  { %v614_v17 = vadd.s32 4294967169, %v34_v16  ;;  %v38_v41 = vor.u32 8388608, %v37_v22 }
  0x8a   :  { %v40_v18 = vadd.s32 1, %v614_v17  ;;  %v78_v55 = vshll.u32 %v38_v41, 8 }
  0x8c   :  { %vm41_vm1 = vcmp.gt.s32.totalorder %v40_v18, 0 }
  0x8d   :  { %v42_v20 = vsel %vm41_vm1, %v40_v18, 0 }
  0x8e   :  { %v44_v21 = vand.u32 31, %v42_v20  ;;  %v43_v24 = vshrl.u32 %v42_v20, 5 }
  0x90   :  { %v45_v23 = vsub.s32 32, %v44_v21  ;;  %v47_v26 = vshll.u32 %v725_v25, %v44_v21  ;;  %v50_v28 = vshll.u32 %v726_v27, %v44_v21  ;;  %v53_v32 = vshll.u32 %v727_v30, %v44_v21 }
  0x91   :  { %v56_v35 = vshll.u32 %v728_v33, %v44_v21  ;;  %v59_v38 = vshll.u32 %v729_v36, %v44_v21  ;;  %vm62_vm2 = vcmp.lt.s32.totalorder %v43_v24, 1  ;;  %vm65_vm3 = vcmp.lt.s32.totalorder %v43_v24, 4 }
  0x92   :  { %v48_v29 = vshrl.u32 %v726_v27, %v45_v23  ;;  %v51_v31 = vshrl.u32 %v727_v30, %v45_v23  ;;  %v54_v34 = vshrl.u32 %v728_v33, %v45_v23  ;;  %v57_v37 = vshrl.u32 %v729_v36, %v45_v23 }
  0x93   :  { %v60_v40 = vshrl.u32 %v730_v39, %v45_v23  ;;  %v46_v50 = vshrl.u32 %v725_v25, %v45_v23  ;;  %vm64_vm4 = vcmp.lt.s32.totalorder %v43_v24, 3  ;;  %vm63_vm5 = vcmp.lt.s32.totalorder %v43_v24, 2  ;;  %v237_v39 = vld [vmem:[%s843_s2] sm:$0xff] }
  0x94   :  { %v49_v42 = vor.u32 %v48_v29, %v47_v26  ;;  %v52_v43 = vor.u32 %v51_v31, %v50_v28  ;;  %v55_v44 = vor.u32 %v54_v34, %v53_v32  ;;  %v58_v45 = vor.u32 %v57_v37, %v56_v35 }
  0x95   :  { %v61_v46 = vor.u32 %v60_v40, %v59_v38  ;;  %v238_v40 = vld [vmem:[%s843_s2 + $0x8] sm:$0xff] }
  0x96   :  { %v67_v47 = vsel %vm65_vm3, %v55_v44, 2102212464  ;;  %v70_v48 = vsel %vm62_vm2, %v49_v42, %v52_v43  ;;  %v74_v49 = vsel %vm62_vm2, %v52_v43, %v55_v44  ;;  %v71_v51 = vsel %vm65_vm3, %v58_v45, 920167782 }
  0x97   :  { %v75_v52 = vsel %vm65_vm3, %v61_v46, 1326507024  ;;  %v72_v53 = vsel %vm64_vm4, %v55_v44, %v71_v51  ;;  %v66_v56 = vsel %vm62_vm2, %v46_v50, %v49_v42  ;;  %v68_v57 = vsel %vm64_vm4, %v52_v43, %v67_v47  ;;  %v239_v51 = vld [vmem:[%s843_s2 + $0x10] sm:$0xff] }
  0x98   :  { %v76_v54 = vsel %vm64_vm4, %v58_v45, %v75_v52  ;;  %v73_v58 = vsel %vm63_vm5, %v70_v48, %v72_v53  ;;  %v69_v0 = vsel %vm63_vm5, %v66_v56, %v68_v57  ;;  %v677_v44 = vpack.c.bf16 %v238_v40, %v237_v39  ;;  %v240_v52 = vld [vmem:[%s843_s2 + $0x18] sm:$0xff]  ;;  %v245_v57 = vld [vmem:[%s843_s2 + $0x40] sm:$0xff] }
  0x99   :  { %v77_v59 = vsel %vm63_vm5, %v74_v49, %v76_v54  ;;  %v777_v62 = vmul.u32.u64.low %v78_v55, %v73_v58  ;;  %v778_v63 = vmul.u32.u64.high %v78_v55, %v73_v58, %v777_v62  ;;  %v85_v3 = vmul.u32 %v78_v55, %v69_v0  ;;  %v244_v56 = vld [vmem:[%s843_s2 + $0x38] sm:$0xff] }
  0x9a   :  { %v774_v60 = vmul.u32.u64.low %v78_v55, %v77_v59  ;;  %v775_v61 = vmul.u32.u64.high %v78_v55, %v77_v59, %v774_v60  ;;  %vm122_vm2 = vweird.f32 %v768_v14  ;;  %v680_v55 = vpack.c.bf16 %v240_v52, %v239_v51  ;;  %v247_v59 = vld [vmem:[%s843_s2 + $0x50] sm:$0xff] }
  0x9b   :  { %v88_v1 = vadd.s32 1, %v778_v63  ;;  %vm325_vm3 = vcmask 261120   ;;  %v683_v58 = vpack.c.bf16 %v245_v57, %v244_v56 }
  0x9c   :  { %vm87_vm6 = vc.u32 %v775_v61, %v777_v62  ;;  %v86_v17 = vadd.s32 %v777_v62, %v775_v61 }
  0x9d   :  { %v89_v4 = vsel %vm87_vm6, %v88_v1, %v778_v63 }
  0x9e   :  { %v90_v6 = vadd.s32 %v89_v4, %v85_v3 }
  0xa0   :  { %v91_v7 = vadd.s32 536870912, %v90_v6 }
  0xa2   :  { %v92_v8 = vshrl.u32 %v91_v7, 30 }
  0xa4   :  { %v93_v9 = vshll.u32 %v92_v8, 30  ;;  %v116_v30 = vsub.s32 4, %v92_v8 }
  0xa6   :  { %v94_v10 = vsub.s32 %v90_v6, %v93_v9  ;;  %v117_v33 = vsel %vm32_vm8, %v116_v30, %v92_v8  ;;  %v625_v6 = vld [vmem:[%s843_s2 + $0x30] ss:$0 sm:$0xff] }
  0xa7   :  { %v119_v35 = vsel %vm31_vm9, 0, %v117_v33 }
  0xa8   :  { %v96_v11 = vsub.s32 0, %v94_v10  ;;  %v123_v36 = vadd.s32 3, %v119_v35  ;;  %v227_v38 = vand.u32 3, %v119_v35 }
  0xaa   :  { %v615_v12 = vmin.u32 %v96_v11, %v94_v10  ;;  %v124_v37 = vand.u32 3, %v123_v36  ;;  %vm232_vm12 = vcmp.eq.s32.totalorder %v227_v38, 2  ;;  %vm229_vm14 = vcmp.eq.s32.totalorder %v227_v38, 0 }
  0xab   :  { %vm228_vm1 = vcmp.lt.s32.totalorder %v227_v38, 2 }
  0xac   :  { %v98_v13 = vclz %v615_v12  ;;  %vm129_vm11 = vcmp.eq.s32.totalorder %v124_v37, 2  ;;  %vm126_vm13 = vcmp.eq.s32.totalorder %v124_v37, 0  ;;  %vm125_vm15 = vcmp.lt.s32.totalorder %v124_v37, 2 }
  0xae   :  { %v616_v15 = vadd.s32 4294967294, %v98_v13 }
  0xb0   :  { %vm617_vm7 = vcmp.lt.s32.totalorder %v616_v15, 0 }
  0xb1   :  { %v101_v16 = vsel %vm617_vm7, 0, %v616_v15  ;;  %vm608_vm7 = vcmask 7168  }
  0xb2   :  { %v102_v18 = vsub.s32 32, %v101_v16  ;;  %v106_v20 = vsub.s32 4294967266, %v101_v16  ;;  %v103_v21 = vshll.u32 %v94_v10, %v101_v16 }
  0xb4   :  { %v104_v22 = vshrl.u32 %v86_v17, %v102_v18  ;;  %v107_v23 = vadd.s32 127, %v106_v20 }
  0xb6   :  { %v105_v24 = vor.u32 %v104_v22, %v103_v21  ;;  %v108_v25 = vshll.u32 %v107_v23, 23 }
  0xb8   :  { %v109_v26 = vor.u32 4788187, %v108_v25  ;;  %v112_v28 = vcvt.s32.f32 %v105_v24 }
  0xba   :  { %v110_v27 = vand.u32 2147483647, %v109_v26 }
  0xbc   :  { %v113_v29 = vmul.f32 %v112_v28, %v110_v27  ;;  %v626_v27 = vld [vmem:[%s843_s2 + $0x58] ss:$0 sm:$0xff] }
  0xbe   :  { %v114_v31 = vxor.u32 2147483648, %v113_v29 }
  0xc0   :  { %v115_v32 = vsel %vm32_vm8, %v114_v31, %v113_v29 }
  0xc1   :  { %v118_v34 = vsel %vm31_vm9, %v768_v14, %v115_v32  ;;  %v14_v14 = vld [vmem:[%s844_s0] sm:$0xff] }
  0xc2   :  { %705 = vcosq.f32 %v118_v34 }
  0xc3   :  { %707 = vsinq.f32 %v118_v34 }
  0xcc   :  { %v706_v41 = vpop.eup %705 }
  0xcd   :  { %v708_v19 = vpop.eup %707  ;;  %v130_v42 = vxor.u32 2147483648, %v706_v41 }
  0xce   :  { %v127_v43 = vxor.u32 2147483648, %v708_v19 }
  0xcf   :  { %v131_v45 = vsel %vm129_vm11, %v130_v42, %v708_v19  ;;  %v234_v46 = vsel %vm232_vm12, %v130_v42, %v708_v19 }
  0xd0   :  { %v128_v47 = vsel %vm126_vm13, %v706_v41, %v127_v43  ;;  %v231_v48 = vsel %vm229_vm14, %v706_v41, %v127_v43 }
  0xd1   :  { %v132_v49 = vsel %vm125_vm15, %v128_v47, %v131_v45  ;;  %v235_v50 = vsel %vm228_vm1, %v231_v48, %v234_v46  ;;  %v628_v46 = vld [vmem:[%s843_s2 + $0x60] ss:$0 sm:$0xff] }
  0xd2   :  { %v133_v53 = vsel %vm122_vm2, nan, %v132_v49  ;;  %v236_v54 = vsel %vm122_vm2, nan, %v235_v50  ;;  %v629_v50 = vld [vmem:[%s843_s2 + $0x68] ss:$0 sm:$0xff] }
  0xd3   :  { %647 = vmatmul.mubr.msk.f32.vlgmr.msra.gmra.mrb[0].mxu1 %vm251_vm10, %v133_v53  ;;  %663 = vmatmul.mubr.msk.f32.vlgmr.msra.gmra.mrb[0].mxu0 %vm251_vm10, %v236_v54 }
  0xd4   :  { %678 = vmatpush3.bf16.msra.mxu1 %v677_v44  ;;  %657 = vmatprep.mubr.msk.f32.mxu1 %vm723_vm0, %v722_v2 }
  0xd5   :  { %679 = vmatprep.subr.bf16.mxu1 %v724_v5  ;;  %673 = vmatprep.mubr.msk.f32.mxu0 %vm723_vm0, %v722_v2  ;;  %v246_v2 = vld [vmem:[%s843_s2 + $0x48] sm:$0xff] }
  0xd6   :  { %684 = vmatpush3.bf16.msra.mxu0 %v683_v58  ;;  %v686_v60 = vpack.c.bf16 %v247_v59, %v246_v2 }
  0xd7   :  { %685 = vmatprep.subr.bf16.mxu0 %v724_v5 }
  0xd8   :  { %681 = vmatpush3.bf16.msra.mxu1 %v680_v55 }
  0xda   :  { %687 = vmatpush3.bf16.msra.mxu0 %v686_v60 }
  0xdb   :  { %658 = vmatmul.mubr.msk.f32.vlgmr.msra.gmra.mrb[2].mxu1 %vm325_vm3, %v14_v14 }
 0x1a6   :  { %v321_v61 = vpop.f32.mrb[0].mxu1  ;;  %v468_v62 = vpop.f32.mrb[0].mxu0 }
 0x1a7   :  { %v648_v63 = vpop.f32.mrb[1].mxu1  ;;  %v664_v0 = vpop.f32.mrb[1].mxu0 }
 0x1ae   :  { %v395_v1 = vpop.f32.mrb[2].mxu1 }
 0x1af   :  { %v396_v3 = vadd.f32 %v395_v1, %v321_v61  ;;  %v659_v4 = vpop.f32.mrb[3].mxu1 }
 0x1b1   :  { %v472_v7 = vadd.f32 %v468_v62, %v396_v3 }
 0x1b3   :  { %v477_v8 = vadd.f32 %v625_v6, %v472_v7 }
 0x1b5   :  { %v481_v9 = vand.u32 2147483647, %v477_v8  ;;  %v478_v21 = vmax.f32 %v477_v8, 0.0  ;;  %vm479_vm4 = vcmp.ne.f32.partialorder %v477_v8, %v477_v8 }
 0x1b7   :  { %v482_v10 = vsub.f32 0.0, %v481_v9 }
 0x1b9   :  { %v483_v11 = vmul.f32 1.442695, %v482_v10 }
 0x1bb   :  { %709 = vpow2.f32 %v483_v11 }
 0x1c5   :  { %v710_v12 = vpop.eup %709 }
 0x1c6   :  { %v485_v5 = vadd.f32 1.0, %v710_v12  ;;  %v488_v13 = vmul.f32 -0.5, %v710_v12  ;;  %v491_v16 = vand.u32 2147483647, %v710_v12 }
 0x1c8   :  { %711 = vlog2.f32 %v485_v5  ;;  %v489_v15 = vadd.f32 1.0, %v488_v13  ;;  %vm492_vm0 = vcmp.lt.f32.partialorder %v491_v16, 0.0004427343 }
 0x1ca   :  { %v490_v20 = vmul.f32 %v710_v12, %v489_v15 }
 0x1d2   :  { %v712_v17 = vpop.eup %711 }
 0x1d3   :  { %v487_v18 = vmul.f32 0.6931472, %v712_v17 }
 0x1d5   :  { %v493_v22 = vsel %vm492_vm0, %v490_v20, %v487_v18 }
 0x1d6   :  { %v494_v23 = vadd.f32 %v493_v22, %v478_v21 }
 0x1d8   :  { %v495_v24 = vsel %vm479_vm4, %v477_v8, %v494_v23 }
 0x1d9   :  { %713 = vtanh.f32 %v495_v24 }
 0x1e3   :  { %v714_v25 = vpop.eup %713 }
 0x1e4   :  { %v497_v26 = vmul.f32 %v714_v25, %v477_v8 }
 0x1e6   :  { %674 = vmatmul.mubr.msk.f32.vlgmr.msra.gmra.mrb[2].mxu0 %vm325_vm3, %v497_v26 }
 0x2b9   :  { %v571_v28 = vpop.f32.mrb[2].mxu0 }
 0x2ba   :  { %v572_v29 = vadd.f32 %v626_v27, %v571_v28  ;;  %v675_v30 = vpop.f32.mrb[3].mxu0 }
 0x2bc   :  { %v578_v31 = vand.u32 2147483647, %v572_v29  ;;  %v575_v19 = vmax.f32 %v572_v29, 0.0  ;;  %vm576_vm6 = vcmp.ne.f32.partialorder %v572_v29, %v572_v29 }
 0x2be   :  { %v579_v32 = vsub.f32 0.0, %v578_v31 }
 0x2c0   :  { %v580_v33 = vmul.f32 1.442695, %v579_v32 }
 0x2c2   :  { %715 = vpow2.f32 %v580_v33 }
 0x2cc   :  { %v716_v34 = vpop.eup %715 }
 0x2cd   :  { %v582_v35 = vadd.f32 1.0, %v716_v34  ;;  %v585_v36 = vmul.f32 -0.5, %v716_v34  ;;  %v588_v38 = vand.u32 2147483647, %v716_v34 }
 0x2cf   :  { %717 = vlog2.f32 %v582_v35  ;;  %v586_v37 = vadd.f32 1.0, %v585_v36  ;;  %vm589_vm5 = vcmp.lt.f32.partialorder %v588_v38, 0.0004427343 }
 0x2d1   :  { %v587_v41 = vmul.f32 %v716_v34, %v586_v37 }
 0x2d9   :  { %v718_v39 = vpop.eup %717 }
 0x2da   :  { %v584_v40 = vmul.f32 0.6931472, %v718_v39 }
 0x2dc   :  { %v590_v42 = vsel %vm589_vm5, %v587_v41, %v584_v40 }
 0x2dd   :  { %v591_v43 = vadd.f32 %v590_v42, %v575_v19 }
 0x2df   :  { %v592_v44 = vsel %vm576_vm6, %v572_v29, %v591_v43 }
 0x2e0   :  { %719 = vtanh.f32 %v592_v44 }
 0x2ea   :  { %v720_v45 = vpop.eup %719 }
 0x2eb   :  { %v594_v47 = vmul.f32 %v720_v45, %v572_v29 }
 0x2ed   :  { %v599_v48 = vmul.f32 %v628_v46, %v594_v47 }
 0x2ef   :  { %v600_v49 = vsel %vm325_vm3, %v599_v48, 0.0 }
 0x2f0   :  { %601 = vadd.xlane.f32.xlu0 %v600_v49 }
 0x37d   :  { %v602_v51 = vpop.xlane.xlu0 %601 }
 0x37e   :  { %v607_v52 = vadd.f32 %v629_v50, %v602_v51 }
 0x380   :  { %609 = vst.msk [vmem:[%s845_s3] sm:$0xff] %vm608_vm7, %v607_v52 }

</bundles_post_ra>
